<compile_context>
chip_gen: v7x
topology: tpu7x:2x2x1
jax: 0.10.0
libtpu: 0.0.40
codegen_flags: <defaults>
</compile_context>

<pallas_src>
import functools

import jax
import jax.numpy as jnp
from jax.experimental import pallas as pl
from jax.experimental.pallas import tpu as pltpu


def _round_up(v, m):
    return ((v + m - 1) // m) * m


def _dt_exp_kernel(xa_ref, cta_ref, aux_ref, o_ref, *,
                   eps, m_actual, needs_mask, has_bias):
    """One N-tile of the distance transform.

    xa_ref : (TN, D+2)   augmented rows  [-2*x, ||x||^2, 1]
    cta_ref: (D+2, Mp)   augmented centers^T  [c ; 1 ; ||c||^2]
    aux_ref: (8, Mp)     row0 = -scaler, row1 = -2*scaler,
                         row2 = valid-column mask, row3 = bias
    o_ref  : (TN, Mp)    output
    """
    # Squared distances straight off the MXU (full-precision f32 passes).
    d2 = jnp.dot(xa_ref[...], cta_ref[...],
                 preferred_element_type=jnp.float32,
                 precision=jax.lax.Precision.HIGHEST)
    d = jnp.sqrt(jnp.maximum(d2, 0.0))                       # (TN, Mp)

    neg_s = aux_ref[0:1, :]                                   # -scaler
    neg_2s = aux_ref[1:2, :]                                  # -2*scaler

    if needs_mask:
        mask = aux_ref[2:3, :]
        dm = d * mask
    else:
        dm = d

    inv_m = 1.0 / float(m_actual)
    inv_m1 = 1.0 / float(m_actual - 1)

    mu = jnp.sum(dm, axis=-1, keepdims=True) * inv_m          # (TN, 1)
    dc = d - mu
    if needs_mask:
        dc = dc * mask
    # Two-pass unbiased variance (matches torch.var; no sum(d^2)-M*mu^2
    # cancellation).
    var = jnp.sum(dc * dc, axis=-1, keepdims=True) * inv_m1
    inv_std = jax.lax.rsqrt(var + eps)
    dn = dc * inv_std
    # exp((-dn - 2) * s) == exp(dn * (-s) + (-2 * s))
    out = jnp.exp(dn * neg_s + neg_2s)
    if has_bias:
        out = out + aux_ref[3:4, :]
    o_ref[...] = out.astype(o_ref.dtype)


def _pick_tile_and_vmem(N, d_aug, m_pad, out_bytes):
    """VMEM-aware N-tile size + scoped-VMEM limit (valid on v5e/v6e/v7x)."""
    budget = 24 << 20                                         # conservative pipelined budget
    fixed = 2 * (d_aug * m_pad * 4 + 8 * m_pad * 4)           # centers^T + aux (double-buffered)
    per_row = 2 * (d_aug * 4 + m_pad * out_bytes)             # x tile + out tile (double-buffered)
    avail = budget - fixed
    vmem_cap_rows = max(8, (avail // per_row) // 8 * 8) if avail > 0 else 8
    size_cap = 1024 if m_pad <= 512 else 512                  # big tiles only when M is small
    cap = min(vmem_cap_rows, size_cap)

    n8 = _round_up(N, 8)
    tile_n = min(n8, cap)
    # Prefer >= 2 grid steps (v7x dual-TC load balance) while keeping tiles big.
    for t in (1024, 512, 256, 128):
        if t <= cap and n8 >= 2 * t:
            tile_n = t
            break

    footprint = fixed + per_row * tile_n
    vmem_limit = int(min(48 << 20, max(footprint + (4 << 20), 16 << 20)))
    return tile_n, vmem_limit


def distance_transform_exp(x, centers, scaler, bias=None, *, eps=1e-5,
                           tile_n=None, out_dtype=jnp.float32):
    """x: (N, D), centers: (M, D), scaler: (1, M) -> (N, M)."""
    N, D = x.shape
    M, D2 = centers.shape
    assert D == D2, "feature dims must match"
    assert M > 1, "need at least 2 centers for unbiased variance"
    assert scaler.shape == (1, M)

    x = x.astype(jnp.float32)
    centers = centers.astype(jnp.float32)
    scaler = scaler.astype(jnp.float32)

    m_pad = _round_up(M, 128)          # lane-dense output
    d_aug = D + 2                      # [-2x, ||x||^2, 1]
    out_bytes = jnp.dtype(out_dtype).itemsize

    auto_tile, vmem_limit = _pick_tile_and_vmem(N, d_aug, m_pad, out_bytes)
    if tile_n is None:
        tile_n = auto_tile
    n_pad = _round_up(N, tile_n)

    x_p = x if n_pad == N else jnp.pad(x, ((0, n_pad - N), (0, 0)))
    c_p = centers if m_pad == M else jnp.pad(centers, ((0, m_pad - M), (0, 0)))
    s_p = scaler if m_pad == M else jnp.pad(scaler, ((0, 0), (0, m_pad - M)))

    # Hoisted, grid-invariant precompute (done once in XLA, not per grid step).
    # d2 = [-2x, ||x||^2, 1] @ [c ; 1 ; ||c||^2]  -> squared dists off the MXU.
    x2 = jnp.sum(x_p * x_p, axis=1, keepdims=True)
    x_aug = jnp.concatenate(
        [x_p * (-2.0), x2, jnp.ones((n_pad, 1), jnp.float32)], axis=1)     # (Np, D+2)
    c2 = jnp.sum(c_p * c_p, axis=1, keepdims=True)
    ct_aug = jnp.concatenate(
        [c_p, jnp.ones((m_pad, 1), jnp.float32), c2], axis=1).T            # (D+2, Mp)

    needs_mask = (m_pad != M)
    has_bias = bias is not None
    aux = jnp.zeros((8, m_pad), jnp.float32)
    aux = aux.at[0, :].set(-s_p[0])            # -scaler
    aux = aux.at[1, :].set(-2.0 * s_p[0])      # -2*scaler
    if needs_mask:
        aux = aux.at[2, :M].set(1.0)           # valid-column mask
    if has_bias:
        bias = jnp.asarray(bias, jnp.float32).reshape(1, M)
        aux = aux.at[3, :M].set(bias[0])

    kernel = functools.partial(
        _dt_exp_kernel, eps=float(eps), m_actual=int(M),
        needs_mask=needs_mask, has_bias=has_bias)

    out = pl.pallas_call(
        kernel,
        out_shape=jax.ShapeDtypeStruct((n_pad, m_pad), out_dtype),
        grid_spec=pltpu.PrefetchScalarGridSpec(
            num_scalar_prefetch=0,
            grid=(n_pad // tile_n,),
            in_specs=[
                pl.BlockSpec((tile_n, d_aug), lambda i: (i, 0)),   # x tile (pipelined)
                pl.BlockSpec((d_aug, m_pad), lambda i: (0, 0)),    # centers^T (resident)
                pl.BlockSpec((8, m_pad), lambda i: (0, 0)),        # merged aux
            ],
            out_specs=pl.BlockSpec((tile_n, m_pad), lambda i: (i, 0)),
        ),
        compiler_params=pltpu.CompilerParams(
            dimension_semantics=("parallel",),
            vmem_limit_bytes=vmem_limit,
        ),
    )(x_aug, ct_aug, aux)

    return out[:N, :M]


def _reference(x, centers, scaler, bias=None, eps=1e-5):
    # Pure-JAX reference mirroring the PyTorch module (exact pairwise diffs,
    # unbiased two-pass variance).
    diff = x[:, None, :] - centers[None, :, :]
    d = jnp.sqrt(jnp.sum(diff * diff, axis=-1))
    mu = jnp.mean(d, axis=1, keepdims=True)
    dc = d - mu
    var = jnp.sum(dc * dc, axis=1, keepdims=True) / (d.shape[1] - 1)
    dn = dc / jnp.sqrt(var + eps)
    out = jnp.exp((-dn - 2.0) * scaler)
    if bias is not None:
        out = out + bias
    return out


if __name__ == "__main__":
    # Small shapes consistent with the module: input_dim=32, num_centers=128.
    N, D, M = 16, 32, 128
    key = jax.random.PRNGKey(0)
    kx, kc = jax.random.split(key)

    x = jax.random.normal(kx, (N, D), dtype=jnp.float32)
    # __init__: centers = randn(M, D) / 3.0 ; scaler = ones(1, M) * 3 / 3 ; bias=False.
    centers = jax.random.normal(kc, (M, D), dtype=jnp.float32) / 3.0
    scaler = jnp.ones((1, M), dtype=jnp.float32)

    out = jax.block_until_ready(distance_transform_exp(x, centers, scaler, eps=1e-5))
    ref = _reference(x, centers, scaler, eps=1e-5)
    assert out.shape == (N, M)
    assert jnp.allclose(out, ref, rtol=1e-4, atol=1e-4), "mismatch vs reference"

    # Larger case: N not a multiple of the tile (exercises N padding / multi-step grid).
    N2 = 300
    x_big = jax.random.normal(jax.random.PRNGKey(1), (N2, D), dtype=jnp.float32)
    out2 = jax.block_until_ready(distance_transform_exp(x_big, centers, scaler, eps=1e-5))
    ref2 = _reference(x_big, centers, scaler, eps=1e-5)
    assert out2.shape == (N2, M)
    assert jnp.allclose(out2, ref2, rtol=1e-4, atol=1e-4), "mismatch vs reference (padded N)"

    # M not a multiple of 128 (exercises the precomputed column-mask path).
    M3 = 100
    centers3 = jax.random.normal(jax.random.PRNGKey(2), (M3, D), dtype=jnp.float32) / 3.0
    scaler3 = jnp.ones((1, M3), dtype=jnp.float32)
    out3 = jax.block_until_ready(distance_transform_exp(x, centers3, scaler3, eps=1e-5))
    ref3 = _reference(x, centers3, scaler3, eps=1e-5)
    assert out3.shape == (N, M3)
    assert jnp.allclose(out3, ref3, rtol=1e-4, atol=1e-4), "mismatch vs reference (padded M)"

    print("KERNEL_OK")
</pallas_src>

<mosaic_0001>
module attributes {stable_mosaic.version = 11 : i64} {
  func.func @_dt_exp_kernel(%arg0: i32, %arg1: memref<16x34xf32, #tpu.memory_space<vmem>>, %arg2: memref<34x128xf32, #tpu.memory_space<vmem>>, %arg3: memref<8x128xf32, #tpu.memory_space<vmem>>, %arg4: memref<16x128xf32, #tpu.memory_space<vmem>>) attributes {dimension_semantics = [#tpu.dimension_semantics<parallel>], iteration_bounds = array<i64: 1>, scalar_prefetch = 0 : i64, scratch_operands = 0 : i64, tpu.core_type = #tpu.core_type<tc>, window_params = [{transform_indices = @transform_0, window_bounds = array<i64: 16, 34>}, {pipeline_mode = #tpu.pipeline_mode<synchronous>, transform_indices = @transform_1, window_bounds = array<i64: 34, 128>}, {pipeline_mode = #tpu.pipeline_mode<synchronous>, transform_indices = @transform_2, window_bounds = array<i64: 8, 128>}, {transform_indices = @transform_3, window_bounds = array<i64: 16, 128>}]} {
    %c0 = arith.constant 0 : index
    %c0_0 = arith.constant 0 : index
    %0 = vector.load %arg1[%c0, %c0_0] : memref<16x34xf32, #tpu.memory_space<vmem>>, vector<16x34xf32>
    %c0_1 = arith.constant 0 : index
    %c0_2 = arith.constant 0 : index
    %1 = vector.load %arg2[%c0_1, %c0_2] : memref<34x128xf32, #tpu.memory_space<vmem>>, vector<34x128xf32>
    %cst = arith.constant dense<0.000000e+00> : vector<16x128xf32>
    %2 = tpu.matmul %0, %1, %cst {dimension_numbers = #tpu.dot_dimension_numbers<[1], [0], [0], [1], [0, 0, 1, 1], [], []>, precision = #tpu.contract_precision<fp32>} : vector<16x34xf32>, vector<34x128xf32>, vector<16x128xf32> -> vector<16x128xf32>
    %cst_3 = arith.constant 0.000000e+00 : f32
    %3 = vector.broadcast %cst_3 : f32 to vector<16x128xf32>
    %4 = arith.maximumf %2, %3 : vector<16x128xf32>
    %5 = math.sqrt %4 : vector<16x128xf32>
    %c0_4 = arith.constant 0 : index
    %c0_5 = arith.constant 0 : index
    %6 = vector.load %arg3[%c0_4, %c0_5] : memref<8x128xf32, #tpu.memory_space<vmem>>, vector<1x128xf32>
    %c1 = arith.constant 1 : index
    %c0_6 = arith.constant 0 : index
    %7 = vector.load %arg3[%c1, %c0_6] : memref<8x128xf32, #tpu.memory_space<vmem>>, vector<1x128xf32>
    %cst_7 = arith.constant dense<0.000000e+00> : vector<16xf32>
    %8 = vector.multi_reduction <add>, %5, %cst_7 [1] : vector<16x128xf32> to vector<16xf32>
    %9 = vector.shape_cast %8 : vector<16xf32> to vector<16x1xf32>
    %cst_8 = arith.constant 7.812500e-03 : f32
    %10 = vector.broadcast %cst_8 : f32 to vector<16x1xf32>
    %11 = arith.mulf %9, %10 : vector<16x1xf32>
    %12 = vector.broadcast %11 : vector<16x1xf32> to vector<16x128xf32>
    %13 = arith.subf %5, %12 : vector<16x128xf32>
    %14 = arith.mulf %13, %13 : vector<16x128xf32>
    %cst_9 = arith.constant dense<0.000000e+00> : vector<16xf32>
    %15 = vector.multi_reduction <add>, %14, %cst_9 [1] : vector<16x128xf32> to vector<16xf32>
    %16 = vector.shape_cast %15 : vector<16xf32> to vector<16x1xf32>
    %cst_10 = arith.constant 0.00787401571 : f32
    %17 = vector.broadcast %cst_10 : f32 to vector<16x1xf32>
    %18 = arith.mulf %16, %17 : vector<16x1xf32>
    %cst_11 = arith.constant 9.99999974E-6 : f32
    %19 = vector.broadcast %cst_11 : f32 to vector<16x1xf32>
    %20 = arith.addf %18, %19 : vector<16x1xf32>
    %21 = math.rsqrt %20 : vector<16x1xf32>
    %22 = vector.broadcast %21 : vector<16x1xf32> to vector<16x128xf32>
    %23 = arith.mulf %13, %22 : vector<16x128xf32>
    %24 = vector.broadcast %6 : vector<1x128xf32> to vector<16x128xf32>
    %25 = arith.mulf %23, %24 : vector<16x128xf32>
    %26 = vector.broadcast %7 : vector<1x128xf32> to vector<16x128xf32>
    %27 = arith.addf %25, %26 : vector<16x128xf32>
    %28 = math.exp %27 : vector<16x128xf32>
    %c0_12 = arith.constant 0 : index
    %c0_13 = arith.constant 0 : index
    %29 = vector.load %arg4[%c0_12, %c0_13] : memref<16x128xf32, #tpu.memory_space<vmem>>, vector<16x128xf32>
    tpu.vector_store %arg4[%c0_12, %c0_13], %28 {strides = array<i32>} : memref<16x128xf32, #tpu.memory_space<vmem>>, vector<16x128xf32>,
    return
  }
  func.func @transform_0(%arg0: i32) -> (i32, i32) {
    %c0_i32 = arith.constant 0 : i32
    %c0_i32_0 = arith.constant 0 : i32
    return %arg0, %c0_i32 : i32, i32
  }
  func.func @transform_1(%arg0: i32) -> (i32, i32) {
    %c0_i32 = arith.constant 0 : i32
    %c0_i32_0 = arith.constant 0 : i32
    %c0_i32_1 = arith.constant 0 : i32
    return %c0_i32, %c0_i32_0 : i32, i32
  }
  func.func @transform_2(%arg0: i32) -> (i32, i32) {
    %c0_i32 = arith.constant 0 : i32
    %c0_i32_0 = arith.constant 0 : i32
    %c0_i32_1 = arith.constant 0 : i32
    return %c0_i32, %c0_i32_0 : i32, i32
  }
  func.func @transform_3(%arg0: i32) -> (i32, i32) {
    %c0_i32 = arith.constant 0 : i32
    %c0_i32_0 = arith.constant 0 : i32
    return %arg0, %c0_i32 : i32, i32
  }
}

</mosaic_0001>

<bundles_post_ra>
// kernel: tpu_custom_call.1
= control target key start
LH: loop header
LB: loop body
LE: loop exit
PB: predicated region body
PF: predicated region fallthrough
CT: control target
= control target key end

     0   :  { %8 = vsyncpa [#allocation3], 0  ;;  %s1124_s0 = inlined_call_operand.hbm [shape: f32[16,34], index: 0, kind: input, shape index: {}]   ;;  %s1125_s1 = inlined_call_operand.hbm [shape: f32[34,128], index: 1, kind: input, shape index: {}]   ;;  %s1126_s2 = inlined_call_operand.hbm [shape: f32[8,128], index: 2, kind: input, shape index: {}]   ;;  %s1127_s3 = inlined_call_operand.hbm [shape: f32[16,128], index: 3, kind: output, shape index: {}]  }
   0x1   :  { %9 = vsyncpa [#allocation6], 0 }
   0x2   :  { %10 = vsyncpa [#allocation4], 0  ;;  %s981_s12 = smov [#allocation5]   ;;  %s982_s14 = smov [#allocation2]  }
   0x3   :  { %s28_s13 = sshll.u32 %s981_s12, 4  ;;  %s16_s15 = sshll.u32 %s982_s14, 4  ;;  %s29_s13 = int_to_ptr.vmem [resolvable:$true] %s28_s13  ;;  %s1007_s15 = int_to_ptr.vmem [resolvable:$true] %s16_s15 }
   0x4   :  { %s887_s18 = scalar_lea.hbm %s1125_s1, 640 }
   0x5   :  { %p888_p0 = scmp.ne.s32.totalorder %s1125_s1, %s887_s18  ;;  %p891_p1 = scmp.lt.u32.totalorder %s887_s18, %s1125_s1 }
   0x7   :  { %p893_p2 = pnand %p891_p1, %p888_p0 }
   0x9   :  { %896 = shalt.err (!%p893_p2)
}
   0xa   :  { %s897_s23 = scalar_lea.vmem %s29_s13, 640  ;;  %p902_p4 = scmp.lt.s32.totalorder %s29_s13, %s29_s13 }
   0xb   :  { %p898_p3 = scmp.ne.s32.totalorder %s29_s13, %s897_s23  ;;  %p903_p5 = scmp.lt.s32.totalorder %s897_s23, %s897_s23 }
   0xd   :  { %p904_p6 = por %p903_p5, %p902_p4 }
   0xf   :  { %p905_p7 = pnand %p904_p6, %p898_p3 }
  0x11   :  { %908 = shalt.err (!%p905_p7)
}
  0x12   :  { %s983_s24 = smov 128   ;;  %s984_s25 = smov 8  }
  0x13   :  { %34 = dma.hbm_to_vmem [thread:$0]  %s1125_s1, 640, %s29_s13, [#allocation6], %s983_s24, %s983_s24, %s984_s25  }
  0x14   :  { %s909_s30 = scalar_lea.hbm %s1124_s0, 256 }
  0x15   :  { %p910_p8 = scmp.ne.s32.totalorder %s1124_s0, %s909_s30  ;;  %p913_p9 = scmp.lt.u32.totalorder %s909_s30, %s1124_s0 }
  0x17   :  { %p915_p10 = pnand %p913_p9, %p910_p8 }
  0x19   :  { %918 = shalt.err (!%p915_p10)
}
  0x1a   :  { %s919_s8 = scalar_lea.vmem %s1007_s15, 256  ;;  %p924_p12 = scmp.lt.s32.totalorder %s1007_s15, %s1007_s15 }
  0x1b   :  { %p920_p11 = scmp.ne.s32.totalorder %s1007_s15, %s919_s8  ;;  %p925_p13 = scmp.lt.s32.totalorder %s919_s8, %s919_s8 }
  0x1d   :  { %p926_p0 = por %p925_p13, %p924_p12 }
  0x1f   :  { %p927_p1 = pnand %p926_p0, %p920_p11 }
  0x21   :  { %930 = shalt.err (!%p927_p1)
}
  0x22   :  { %22 = dma.hbm_to_vmem [thread:$0]  %s1124_s0, 256, %s1007_s15, [#allocation3], %s983_s24, %s983_s24, %s984_s25  }
  0x23   :  { %s985_s10 = smov [#allocation7]   ;;  %s931_s14 = scalar_lea.hbm %s1126_s2, 128 }
  0x24   :  { %s41_s11 = sshll.u32 %s985_s10, 4  ;;  %p932_p2 = scmp.ne.s32.totalorder %s1126_s2, %s931_s14  ;;  %s42_s11 = int_to_ptr.vmem [resolvable:$true] %s41_s11 }
  0x25   :  { %p935_p3 = scmp.lt.u32.totalorder %s931_s14, %s1126_s2 }
  0x27   :  { %p937_p4 = pnand %p935_p3, %p932_p2 }
  0x29   :  { %940 = shalt.err (!%p937_p4)
}
  0x2a   :  { %s941_s20 = scalar_lea.vmem %s42_s11, 128  ;;  %p946_p6 = scmp.lt.s32.totalorder %s42_s11, %s42_s11 }
  0x2b   :  { %p942_p5 = scmp.ne.s32.totalorder %s42_s11, %s941_s20  ;;  %p947_p7 = scmp.lt.s32.totalorder %s941_s20, %s941_s20 }
  0x2d   :  { %p948_p8 = por %p947_p7, %p946_p6 }
  0x2f   :  { %p949_p9 = pnand %p948_p8, %p942_p5 }
  0x31   :  { %952 = shalt.err (!%p949_p9)
}
  0x32   :  { %44 = dma.hbm_to_vmem [thread:$0]  %s1126_s2, 128, %s42_s11, [#allocation6]  }
  0x33   :  { %975 = dma.done.wait [#allocation3], 256  }
  0x34   :  { %976 = vsyncadd [#allocation3], 4294967040 }
  0x35   :  { %977 = dma.done.wait [#allocation6], 768  }
  0x36   :  { %978 = vsyncadd [#allocation6], 4294966528  ;;  %vm68_vm0 = vcmask 1041408   ;;  %v56_v0 = vld [vmem:[#allocation5] sm:$0xff]  ;;  %v57_v1 = vld [vmem:[#allocation5 + $0x8] sm:$0xff]  ;;  %vm61_vm1 = vcmask 277504  }
  0x37   :  { %v58_v2 = vld [vmem:[#allocation5 + $0x10] sm:$0xff]  ;;  %v73_v3 = vand.u32 4294901760, %v56_v0  ;;  %v76_v4 = vand.u32 4294901760, %v57_v1  ;;  %v59_v5 = vld [vmem:[#allocation5 + $0x18] sm:$0xff]  ;;  %v60_v7 = vld [vmem:[#allocation5 + $0x20] sm:$0x3] }
  0x38   :  { %v79_v6 = vand.u32 4294901760, %v58_v2  ;;  %v82_v8 = vand.u32 4294901760, %v59_v5  ;;  %v70_v9 = vsel %vm68_vm0, %v60_v7, 0  ;;  %v54_v10 = vld [vmem:[#allocation2] sm:$0xff]  ;;  %v55_v11 = vld [vmem:[#allocation2 + $0x8] sm:$0xff]  ;;  %s986_s2 = smov [#allocation8]  }
  0x39   :  { %v1056_v12 = vpack.c.bf16 %v76_v4, %v73_v3  ;;  %v1058_v13 = vand.u32 4294901760, %v70_v9  ;;  %v63_v14 = vsel %vm61_vm1, %v54_v10, 0  ;;  %v66_v15 = vsel %vm61_vm1, %v55_v11, 0  ;;  %s676_s21 = sshll.u32 %s986_s2, 4  ;;  %s677_s21 = int_to_ptr.vmem [resolvable:$true] %s676_s21 }
  0x3a   :  { %v1060_v16 = vpack.c.bf16 %v82_v8, %v79_v6  ;;  %v1062_v17 = vand.u32 4294901760, %v63_v14  ;;  %v1064_v18 = vand.u32 4294901760, %v66_v15  ;;  %v164_v19 = vsub.f32 %v56_v0, %v73_v3  ;;  %s953_s22 = scalar_lea.vmem %s677_s21, 256  ;;  %p958_p11 = scmp.lt.s32.totalorder %s677_s21, %s677_s21 }
  0x3b   :  { %812 = vmatprep.subr.bf16.mxu1 %v1056_v12  ;;  %836 = vmatprep.subr.bf16.mxu0 %v1056_v12  ;;  %v171_v20 = vsub.f32 %v57_v1, %v76_v4  ;;  %v178_v21 = vsub.f32 %v58_v2, %v79_v6  ;;  %v185_v22 = vsub.f32 %v59_v5, %v82_v8  ;;  %p954_p10 = scmp.ne.s32.totalorder %s677_s21, %s953_s22  ;;  %p959_p12 = scmp.lt.s32.totalorder %s953_s22, %s953_s22 }
  0x3c   :  { %814 = vmatpush3.bf16.msra.mxu1 %v1056_v12  ;;  %838 = vmatpush3.bf16.msra.mxu0 %v1056_v12  ;;  %v1071_v23 = vsub.f32 %v63_v14, %v1062_v17  ;;  %v165_v24 = vand.u32 4294901760, %v164_v19  ;;  %v1074_v25 = vsub.f32 %v66_v15, %v1064_v18  ;;  %v1077_v26 = vsub.f32 %v70_v9, %v1058_v13 }
  0x3d   :  { %816 = vmatprep.subr.bf16.mxu1 %v1060_v16  ;;  %840 = vmatprep.subr.bf16.mxu0 %v1060_v16  ;;  %v172_v27 = vand.u32 4294901760, %v171_v20  ;;  %v179_v28 = vand.u32 4294901760, %v178_v21  ;;  %v186_v29 = vand.u32 4294901760, %v185_v22  ;;  %v827_v51 = vpack.c.bf16 %v171_v20, %v164_v19  ;;  %p960_p13 = por %p959_p12, %p958_p11 }
  0x3e   :  { %v144_v30 = vand.u32 4294901760, %v1071_v23  ;;  %v166_v31 = vsub.f32 %v164_v19, %v165_v24  ;;  %v154_v32 = vand.u32 4294901760, %v1074_v25  ;;  %v193_v39 = vand.u32 4294901760, %v1077_v26 }
  0x3f   :  { %v173_v33 = vsub.f32 %v171_v20, %v172_v27  ;;  %v180_v34 = vsub.f32 %v178_v21, %v179_v28  ;;  %v187_v35 = vsub.f32 %v185_v22, %v186_v29  ;;  %v843_v44 = vpack.c.bf16 %v172_v27, %v165_v24  ;;  %v690_v24 = vld [vmem:[#allocation7 + $0x1] ss:$0 sm:$0xff]  ;;  %p961_p0 = pnand %p960_p13, %p954_p10 }
  0x40   :  { %818 = vmatpush3.bf16.msra.mxu1 %v1060_v16  ;;  %842 = vmatpush3.bf16.msra.mxu0 %v1060_v16  ;;  %v145_v36 = vsub.f32 %v1071_v23, %v144_v30  ;;  %v167_v37 = vand.u32 4294901760, %v166_v31  ;;  %v155_v38 = vsub.f32 %v1074_v25, %v154_v32  ;;  %v194_v48 = vsub.f32 %v1077_v26, %v193_v39 }
  0x41   :  { %741 = vmatprep.subr.mxu1 %v1058_v13  ;;  %780 = vmatprep.subr.mxu0 %v1058_v13  ;;  %v174_v40 = vand.u32 4294901760, %v173_v33  ;;  %v181_v41 = vand.u32 4294901760, %v180_v34  ;;  %v188_v42 = vand.u32 4294901760, %v187_v35  ;;  %v847_v49 = vpack.c.bf16 %v186_v29, %v179_v28 }
  0x42   :  { %v146_v43 = vand.u32 4294901760, %v145_v36  ;;  %782 = vmatprep.mubr.f32.mxu0 %v144_v30  ;;  %v156_v45 = vand.u32 4294901760, %v155_v38  ;;  %v195_v50 = vand.u32 4294901760, %v194_v48  ;;  %v831_v52 = vpack.c.bf16 %v185_v22, %v178_v21  ;;  %v689_v22 = vld [vmem:[#allocation7] ss:$0 sm:$0xff] }
  0x43   :  { %v819_v46 = vpack.c.bf16 %v174_v40, %v167_v37  ;;  %v823_v47 = vpack.c.bf16 %v188_v42, %v181_v41 }
  0x44   :  { %742 = vmatpush3.msra.mxu1 %v1058_v13  ;;  %781 = vmatpush3.msra.mxu0 %v1058_v13 }
  0x45   :  { %743 = vmatprep.mubr.f32.mxu1 %v146_v43  ;;  %820 = vmatprep.subr.bf16.mxu1 %v819_v46 }
  0x46   :  { %844 = vmatprep.subr.bf16.mxu0 %v843_v44  ;;  %744 = vmatmul.mubr.f32.vlgmr.msra.gmra.mrb[0].mxu1 %v156_v45 }
  0x47   :  { %822 = vmatpush3.bf16.msra.mxu1 %v819_v46  ;;  %783 = vmatmul.mubr.f32.vlgmr.msra.gmra.mrb[0].mxu0 %v154_v32 }
  0x48   :  { %846 = vmatpush3.bf16.msra.mxu0 %v843_v44  ;;  %824 = vmatprep.subr.bf16.mxu1 %v823_v47 }
  0x49   :  { %848 = vmatprep.subr.bf16.mxu0 %v847_v49  ;;  %756 = vmatprep.mubr.f32.mxu1 %v1062_v17 }
  0x4a   :  { %795 = vmatprep.mubr.f32.mxu0 %v1062_v17 }
  0x4b   :  { %826 = vmatpush3.bf16.msra.mxu1 %v823_v47 }
  0x4c   :  { %850 = vmatpush3.bf16.msra.mxu0 %v847_v49  ;;  %754 = vmatprep.subr.mxu1 %v195_v50 }
  0x4d   :  { %793 = vmatprep.subr.mxu0 %v193_v39 }
  0x4f   :  { %755 = vmatpush3.msra.mxu1 %v195_v50 }
  0x50   :  { %794 = vmatpush3.msra.mxu0 %v193_v39  ;;  %828 = vmatprep.subr.bf16.mxu1 %v827_v51 }
  0x51   :  { %852 = vmatprep.subr.bf16.mxu0 %v1056_v12  ;;  %757 = vmatmul.mubr.f32.vlgmr.msra.gmra.mrb[0].mxu1 %v1064_v18 }
  0x52   :  { %830 = vmatpush3.bf16.msra.mxu1 %v827_v51  ;;  %796 = vmatmul.mubr.f32.vlgmr.msra.gmra.mrb[0].mxu0 %v1064_v18 }
  0x53   :  { %854 = vmatpush3.bf16.msra.mxu0 %v1056_v12  ;;  %832 = vmatprep.subr.bf16.mxu1 %v831_v52 }
  0x54   :  { %856 = vmatprep.subr.bf16.mxu0 %v1060_v16  ;;  %769 = vmatprep.mubr.f32.mxu1 %v1071_v23 }
  0x55   :  { %808 = vmatprep.mubr.f32.mxu0 %v1062_v17 }
  0x56   :  { %834 = vmatpush3.bf16.msra.mxu1 %v831_v52 }
  0x57   :  { %858 = vmatpush3.bf16.msra.mxu0 %v1060_v16  ;;  %767 = vmatprep.subr.mxu1 %v1077_v26 }
  0x58   :  { %806 = vmatprep.subr.mxu0 %v1058_v13 }
  0x5a   :  { %768 = vmatpush3.msra.mxu1 %v1077_v26 }
  0x5b   :  { %807 = vmatpush3.msra.mxu0 %v1058_v13  ;;  %770 = vmatmul.mubr.f32.vlgmr.msra.gmra.mrb[0].mxu1 %v1074_v25 }
  0x5c   :  { %809 = vmatmul.mubr.f32.vlgmr.msra.gmra.mrb[0].mxu0 %v1064_v18 }
 0x12e   :  { %v771_v53 = vpop.f32.mrb[0].mxu1 }
 0x12f   :  { %v810_v54 = vpop.f32.mrb[0].mxu0  ;;  %v342_v55 = vpop.f32.mrb[1].mxu1 }
 0x130   :  { %v859_v56 = vadd.f32 %v810_v54, %v771_v53  ;;  %v603_v57 = vpop.f32.mrb[1].mxu0 }
 0x131   :  { %v860_v58 = vadd.f32 %v603_v57, %v342_v55 }
 0x132   :  { %v614_v59 = vmax.f32 %v859_v56, 0.0 }
 0x133   :  { %v613_v60 = vmax.f32 %v860_v58, 0.0 }
 0x134   :  { %875 = vrsqrt.f32 %v614_v59  ;;  %vm624_vm4 = vcmp.eq.f32.partialorder %v614_v59, inf  ;;  %v627_v5 = vand.u32 2147483648, %v614_v59  ;;  %vm626_vm5 = vcmp.eq.f32.partialorder %v614_v59, 0.0 }
 0x135   :  { %877 = vrsqrt.f32 %v613_v60  ;;  %vm617_vm2 = vcmp.eq.f32.partialorder %v613_v60, inf  ;;  %v620_v1 = vand.u32 2147483648, %v613_v60  ;;  %vm619_vm3 = vcmp.eq.f32.partialorder %v613_v60, 0.0 }
 0x13e   :  { %v876_v61 = vpop.eup %875 }
 0x13f   :  { %v878_v62 = vpop.eup %877  ;;  %v623_v0 = vmul.f32 %v876_v61, %v614_v59 }
 0x140   :  { %v616_v63 = vmul.f32 %v878_v62, %v613_v60 }
 0x141   :  { %v625_v4 = vsel %vm624_vm4, %v614_v59, %v623_v0 }
 0x142   :  { %v618_v2 = vsel %vm617_vm2, %v613_v60, %v616_v63  ;;  %v628_v6 = vsel %vm626_vm5, %v627_v5, %v625_v4 }
 0x143   :  { %v621_v3 = vsel %vm619_vm3, %v620_v1, %v618_v2 }
 0x144   :  { %631 = vadd.xlane.f32.xlu0 %v621_v3 }
 0x148   :  { %633 = vadd.xlane.f32.xlu0 %v628_v6 }
 0x1d1   :  { %v632_v7 = vpop.xlane.xlu0 %631 }
 0x1d2   :  { %v635_v8 = vmul.f32 0.0078125, %v632_v7 }
 0x1d4   :  { %v637_v9 = vsub.f32 %v621_v3, %v635_v8 }
 0x1d5   :  { %v634_v10 = vpop.xlane.xlu0 %633 }
 0x1d6   :  { %v636_v11 = vmul.f32 0.0078125, %v634_v10  ;;  %v639_v12 = vmul.f32 %v637_v9, %v637_v9 }
 0x1d8   :  { %v638_v13 = vsub.f32 %v628_v6, %v636_v11  ;;  %641 = vadd.xlane.f32.xlu1 %v639_v12 }
 0x1da   :  { %v640_v14 = vmul.f32 %v638_v13, %v638_v13 }
 0x1dc   :  { %643 = vadd.xlane.f32.xlu1 %v640_v14 }
 0x265   :  { %v642_v15 = vpop.xlane.xlu1 %641 }
 0x266   :  { %v645_v16 = vmul.f32 0.007874016, %v642_v15 }
 0x268   :  { %v647_v17 = vadd.f32 1e-05, %v645_v16 }
 0x269   :  { %v644_v18 = vpop.xlane.xlu1 %643 }
 0x26a   :  { %879 = vrsqrt.f32 %v647_v17  ;;  %v646_v19 = vmul.f32 0.007874016, %v644_v18 }
 0x26c   :  { %v648_v20 = vadd.f32 1e-05, %v646_v19 }
 0x26e   :  { %881 = vrsqrt.f32 %v648_v20 }
 0x274   :  { %v880_v21 = vpop.eup %879 }
 0x275   :  { %v651_v23 = vmul.f32 %v880_v21, %v637_v9 }
 0x277   :  { %v657_v25 = vmul.f32 %v689_v22, %v651_v23 }
 0x278   :  { %v882_v26 = vpop.eup %881 }
 0x279   :  { %v652_v27 = vmul.f32 %v882_v26, %v638_v13  ;;  %v663_v28 = vadd.f32 %v690_v24, %v657_v25 }
 0x27b   :  { %v658_v29 = vmul.f32 %v689_v22, %v652_v27  ;;  %v665_v30 = vmul.f32 1.442695, %v663_v28 }
 0x27d   :  { %v664_v31 = vadd.f32 %v690_v24, %v658_v29  ;;  %883 = vpow2.f32 %v665_v30 }
 0x27f   :  { %v667_v32 = vmul.f32 1.442695, %v664_v31 }
 0x281   :  { %885 = vpow2.f32 %v667_v32 }
 0x287   :  { %v884_v33 = vpop.eup %883 }
 0x288   :  { %669 = vst [vmem:[#allocation8] sm:$0xff] %v884_v33 }
 0x28b   :  { %v886_v34 = vpop.eup %885 }
 0x28c   :  { %670 = vst [vmem:[#allocation8 + $0x8] sm:$0xff] %v886_v34 }
 0x28d   :  { %964 = shalt.err (!%p961_p0)
}
 0x28e   :  { %s965_s27 = scalar_lea.hbm %s1127_s3, 256 }
 0x28f   :  { %p966_p1 = scmp.ne.s32.totalorder %s1127_s3, %s965_s27  ;;  %p969_p2 = scmp.lt.u32.totalorder %s965_s27, %s1127_s3 }
 0x291   :  { %p971_p3 = pnand %p969_p2, %p966_p1 }
 0x293   :  { %974 = shalt.err (!%p971_p3)
}
 0x294   :  { %682 = dma.vmem_to_hbm [thread:$0]  %s677_s21, 256, %s1127_s3, [#allocation4], %s983_s24, %s983_s24, %s984_s25  }
 0x295   :  { %979 = dma.done.wait [#allocation4], 256  }
 0x296   :  { %980 = vsyncadd [#allocation4], 4294967040 }
 0x297   :  { %686 = vsyncpa [#allocation3], 1 }
 0x298   :  { %687 = vsyncpa [#allocation6], 1 }
 0x299   :  { %688 = vsyncpa [#allocation4], 1 }

</bundles_post_ra>
